<compile_context>
chip_gen: v7x
topology: tpu7x:2x2x1
jax: 0.10.0
libtpu: 0.0.40
codegen_flags: <defaults>
</compile_context>

<pallas_src>
import jax
import jax.numpy as jnp
from jax.experimental import pallas as pl
from jax.experimental.pallas import tpu as pltpu


def _critic_kernel(x_ref, w1_ref, b1_ref, w2_ref, b2_ref, w3_ref, b3_ref, v_ref):
    # Batch-major (tile, obs) block arrives straight from HBM (no wrapper
    # transpose).  Relayout to feature-major (obs, tile) on the XLU so the
    # batch rides the 128-wide lane axis for every downstream op: full vregs
    # for bias/ReLU, MXU N = tile, and a lane-dense (1, tile) output store.
    xT = x_ref[...].T                                                     # (obs, tile)
    h1 = jnp.dot(w1_ref[...], xT, preferred_element_type=jnp.float32)     # (64, tile)
    h1 = jnp.maximum(h1 + b1_ref[...], 0.0)
    h2 = jnp.dot(w2_ref[...], h1, preferred_element_type=jnp.float32)     # (32, tile)
    h2 = jnp.maximum(h2 + b2_ref[...], 0.0)
    # Final (32 -> 1) layer: VPU broadcast-multiply + cross-sublane reduce
    # (keeps the N=1 matmul off the MXU; store stays lane-dense).
    v = jnp.sum(h2 * w3_ref[...], axis=0, keepdims=True) + b3_ref[...]    # (1, tile)
    v_ref[...] = v.astype(v_ref.dtype)


def _choose_tile(B, tm):
    """Pick the batch tile (lane width per grid step)."""
    if B <= 256:
        # Single block equal to the full extent: no 128-alignment requirement.
        return B
    tm = max(128, (tm // 128) * 128)
    # Aim for >= ~4 grid steps (v7x has 2 TensorCores and "parallel" only
    # shards when grid > 1), but never below 128 lanes and never above tm.
    per_step = max(128, (pl.cdiv(B, 4) // 128) * 128)
    return min(per_step, tm)


def critic_forward(state, params, *, tm=8192):
    """state: (B, obs) float32.  Returns V: (B, 1) float32."""
    w1, b1, w2, b2, w3, b3 = params
    B, obs = state.shape
    h0 = w1.shape[1]
    h1d = w2.shape[1]

    # Tiny, one-off weight relayouts (feature-major weights, column biases).
    w1t, b1c = w1.T, b1.T             # (h0, obs), (h0, 1)
    w2t, b2c = w2.T, b2.T             # (h1d, h0), (h1d, 1)
    w3c = w3                          # (h1d, 1) column vector
    b3c = b3                          # (1, 1)

    tile = _choose_tile(B, tm)
    grid = (pl.cdiv(B, tile),)        # partial trailing block allowed (no pad)

    in_specs = [
        pl.BlockSpec((tile, obs), lambda i: (i, 0)),    # state, batch-major, tiled
        pl.BlockSpec((h0, obs), lambda i: (0, 0)),      # W1^T (resident)
        pl.BlockSpec((h0, 1), lambda i: (0, 0)),        # b1   (column)
        pl.BlockSpec((h1d, h0), lambda i: (0, 0)),      # W2^T
        pl.BlockSpec((h1d, 1), lambda i: (0, 0)),       # b2
        pl.BlockSpec((h1d, 1), lambda i: (0, 0)),       # w3 column
        pl.BlockSpec((1, 1), lambda i: (0, 0)),         # b3
    ]
    out_spec = pl.BlockSpec((1, tile), lambda i: (0, i))  # lane-dense output

    v_row = pl.pallas_call(
        _critic_kernel,
        out_shape=jax.ShapeDtypeStruct((1, B), jnp.float32),
        grid_spec=pltpu.PrefetchScalarGridSpec(
            num_scalar_prefetch=0,
            grid=grid,
            in_specs=in_specs,
            out_specs=out_spec,
        ),
        compiler_params=pltpu.CompilerParams(
            dimension_semantics=("parallel",)),
    )(state, w1t, b1c, w2t, b2c, w3c, b3c)

    # Single cheap reshape to the torch-shaped (B, 1) output.
    return v_row.reshape(B, 1)


def init_critic_params(key, observation_space, hiddens=(64, 32)):
    """Deterministic init mimicking torch.nn.Linear default
    (U[-1/sqrt(fan_in), 1/sqrt(fan_in)]). Weights stored (in_features, out_features)."""
    dims = [observation_space, hiddens[0], hiddens[1], 1]
    params = []
    for i in range(3):
        fan_in, fan_out = dims[i], dims[i + 1]
        key, kw, kb = jax.random.split(key, 3)
        bound = 1.0 / jnp.sqrt(jnp.float32(fan_in))
        w = jax.random.uniform(kw, (fan_in, fan_out), jnp.float32, -bound, bound)
        b = jax.random.uniform(kb, (1, fan_out), jnp.float32, -bound, bound)
        params += [w, b]
    return tuple(params)


def _reference_forward(state, params):
    w1, b1, w2, b2, w3, b3 = params
    h = jnp.maximum(state @ w1 + b1, 0.0)
    h = jnp.maximum(h @ w2 + b2, 0.0)
    return h @ w3 + b3


if __name__ == "__main__":
    observation_space = 32
    hiddens = (64, 32)

    key = jax.random.PRNGKey(0)
    k_small, k_params, k_big = jax.random.split(key, 3)
    params = init_critic_params(k_params, observation_space, hiddens)

    # Small-batch path (single tile, block == full array extent).
    state = jax.random.normal(k_small, (8, observation_space), jnp.float32)
    v = jax.block_until_ready(critic_forward(state, params))
    v_ref = _reference_forward(state, params)
    assert v.shape == (8, 1)
    assert jnp.allclose(v, v_ref, atol=1e-5, rtol=1e-5), "small-batch mismatch"

    # Tiled path: B > 256, grid of several 128-lane steps with a PARTIAL
    # trailing block (no pad copy) — exercises the masked-store edge case.
    state_big = jax.random.normal(k_big, (300, observation_space), jnp.float32)
    v_big = jax.block_until_ready(critic_forward(state_big, params))
    v_big_ref = _reference_forward(state_big, params)
    assert v_big.shape == (300, 1)
    assert jnp.allclose(v_big, v_big_ref, atol=1e-5, rtol=1e-5), "tiled mismatch"

    print("KERNEL_OK")
</pallas_src>

<mosaic_0001>
module attributes {stable_mosaic.version = 11 : i64} {
  func.func @_critic_kernel(%arg0: i32, %arg1: memref<8x32xf32, #tpu.memory_space<vmem>>, %arg2: memref<64x32xf32, #tpu.memory_space<vmem>>, %arg3: memref<64x1xf32, #tpu.memory_space<vmem>>, %arg4: memref<32x64xf32, #tpu.memory_space<vmem>>, %arg5: memref<32x1xf32, #tpu.memory_space<vmem>>, %arg6: memref<32x1xf32, #tpu.memory_space<vmem>>, %arg7: memref<1x1xf32, #tpu.memory_space<vmem>>, %arg8: memref<1x8xf32, #tpu.memory_space<vmem>>) attributes {dimension_semantics = [#tpu.dimension_semantics<parallel>], iteration_bounds = array<i64: 1>, scalar_prefetch = 0 : i64, scratch_operands = 0 : i64, tpu.core_type = #tpu.core_type<tc>, window_params = [{transform_indices = @transform_0, window_bounds = array<i64: 8, 32>}, {pipeline_mode = #tpu.pipeline_mode<synchronous>, transform_indices = @transform_1, window_bounds = array<i64: 64, 32>}, {pipeline_mode = #tpu.pipeline_mode<synchronous>, transform_indices = @transform_2, window_bounds = array<i64: 64, 1>}, {pipeline_mode = #tpu.pipeline_mode<synchronous>, transform_indices = @transform_3, window_bounds = array<i64: 32, 64>}, {pipeline_mode = #tpu.pipeline_mode<synchronous>, transform_indices = @transform_4, window_bounds = array<i64: 32, 1>}, {pipeline_mode = #tpu.pipeline_mode<synchronous>, transform_indices = @transform_5, window_bounds = array<i64: 32, 1>}, {pipeline_mode = #tpu.pipeline_mode<synchronous>, transform_indices = @transform_6, window_bounds = array<i64: 1, 1>}, {transform_indices = @transform_7, window_bounds = array<i64: 1, 8>}]} {
    %c0 = arith.constant 0 : index
    %c0_0 = arith.constant 0 : index
    %0 = vector.load %arg1[%c0, %c0_0] : memref<8x32xf32, #tpu.memory_space<vmem>>, vector<8x32xf32>
    %1 = tpu.transpose %0, [1, 0] : vector<8x32xf32> -> vector<32x8xf32>
    %c0_1 = arith.constant 0 : index
    %c0_2 = arith.constant 0 : index
    %2 = vector.load %arg2[%c0_1, %c0_2] : memref<64x32xf32, #tpu.memory_space<vmem>>, vector<64x32xf32>
    %cst = arith.constant dense<0.000000e+00> : vector<64x8xf32>
    %3 = tpu.matmul %2, %1, %cst {dimension_numbers = #tpu.dot_dimension_numbers<[1], [0], [0], [1], [0, 0, 1, 1], [], []>} : vector<64x32xf32>, vector<32x8xf32>, vector<64x8xf32> -> vector<64x8xf32>
    %c0_3 = arith.constant 0 : index
    %c0_4 = arith.constant 0 : index
    %4 = vector.load %arg3[%c0_3, %c0_4] : memref<64x1xf32, #tpu.memory_space<vmem>>, vector<64x1xf32>
    %5 = vector.broadcast %4 : vector<64x1xf32> to vector<64x8xf32>
    %6 = arith.addf %3, %5 : vector<64x8xf32>
    %cst_5 = arith.constant 0.000000e+00 : f32
    %7 = vector.broadcast %cst_5 : f32 to vector<64x8xf32>
    %8 = arith.maximumf %6, %7 : vector<64x8xf32>
    %c0_6 = arith.constant 0 : index
    %c0_7 = arith.constant 0 : index
    %9 = vector.load %arg4[%c0_6, %c0_7] : memref<32x64xf32, #tpu.memory_space<vmem>>, vector<32x64xf32>
    %cst_8 = arith.constant dense<0.000000e+00> : vector<32x8xf32>
    %10 = tpu.matmul %9, %8, %cst_8 {dimension_numbers = #tpu.dot_dimension_numbers<[1], [0], [0], [1], [0, 0, 1, 1], [], []>} : vector<32x64xf32>, vector<64x8xf32>, vector<32x8xf32> -> vector<32x8xf32>
    %c0_9 = arith.constant 0 : index
    %c0_10 = arith.constant 0 : index
    %11 = vector.load %arg5[%c0_9, %c0_10] : memref<32x1xf32, #tpu.memory_space<vmem>>, vector<32x1xf32>
    %12 = vector.broadcast %11 : vector<32x1xf32> to vector<32x8xf32>
    %13 = arith.addf %10, %12 : vector<32x8xf32>
    %cst_11 = arith.constant 0.000000e+00 : f32
    %14 = vector.broadcast %cst_11 : f32 to vector<32x8xf32>
    %15 = arith.maximumf %13, %14 : vector<32x8xf32>
    %c0_12 = arith.constant 0 : index
    %c0_13 = arith.constant 0 : index
    %16 = vector.load %arg6[%c0_12, %c0_13] : memref<32x1xf32, #tpu.memory_space<vmem>>, vector<32x1xf32>
    %17 = vector.broadcast %16 : vector<32x1xf32> to vector<32x8xf32>
    %18 = arith.mulf %15, %17 : vector<32x8xf32>
    %cst_14 = arith.constant dense<0.000000e+00> : vector<8xf32>
    %19 = vector.multi_reduction <add>, %18, %cst_14 [0] : vector<32x8xf32> to vector<8xf32>
    %20 = vector.shape_cast %19 : vector<8xf32> to vector<1x8xf32>
    %c0_15 = arith.constant 0 : index
    %c0_16 = arith.constant 0 : index
    %21 = vector.load %arg7[%c0_15, %c0_16] : memref<1x1xf32, #tpu.memory_space<vmem>>, vector<1x1xf32>
    %22 = vector.broadcast %21 : vector<1x1xf32> to vector<1x8xf32>
    %23 = arith.addf %20, %22 : vector<1x8xf32>
    %c0_17 = arith.constant 0 : index
    %c0_18 = arith.constant 0 : index
    %24 = vector.load %arg8[%c0_17, %c0_18] : memref<1x8xf32, #tpu.memory_space<vmem>>, vector<1x8xf32>
    tpu.vector_store %arg8[%c0_17, %c0_18], %23 {strides = array<i32>} : memref<1x8xf32, #tpu.memory_space<vmem>>, vector<1x8xf32>,
    return
  }
  func.func @transform_0(%arg0: i32) -> (i32, i32) {
    %c0_i32 = arith.constant 0 : i32
    %c0_i32_0 = arith.constant 0 : i32
    return %arg0, %c0_i32 : i32, i32
  }
  func.func @transform_1(%arg0: i32) -> (i32, i32) {
    %c0_i32 = arith.constant 0 : i32
    %c0_i32_0 = arith.constant 0 : i32
    %c0_i32_1 = arith.constant 0 : i32
    return %c0_i32, %c0_i32_0 : i32, i32
  }
  func.func @transform_2(%arg0: i32) -> (i32, i32) {
    %c0_i32 = arith.constant 0 : i32
    %c0_i32_0 = arith.constant 0 : i32
    %c0_i32_1 = arith.constant 0 : i32
    return %c0_i32, %c0_i32_0 : i32, i32
  }
  func.func @transform_3(%arg0: i32) -> (i32, i32) {
    %c0_i32 = arith.constant 0 : i32
    %c0_i32_0 = arith.constant 0 : i32
    %c0_i32_1 = arith.constant 0 : i32
    return %c0_i32, %c0_i32_0 : i32, i32
  }
  func.func @transform_4(%arg0: i32) -> (i32, i32) {
    %c0_i32 = arith.constant 0 : i32
    %c0_i32_0 = arith.constant 0 : i32
    %c0_i32_1 = arith.constant 0 : i32
    return %c0_i32, %c0_i32_0 : i32, i32
  }
  func.func @transform_5(%arg0: i32) -> (i32, i32) {
    %c0_i32 = arith.constant 0 : i32
    %c0_i32_0 = arith.constant 0 : i32
    %c0_i32_1 = arith.constant 0 : i32
    return %c0_i32, %c0_i32_0 : i32, i32
  }
  func.func @transform_6(%arg0: i32) -> (i32, i32) {
    %c0_i32 = arith.constant 0 : i32
    %c0_i32_0 = arith.constant 0 : i32
    %c0_i32_1 = arith.constant 0 : i32
    return %c0_i32, %c0_i32_0 : i32, i32
  }
  func.func @transform_7(%arg0: i32) -> (i32, i32) {
    %c0_i32 = arith.constant 0 : i32
    %c0_i32_0 = arith.constant 0 : i32
    return %c0_i32, %arg0 : i32, i32
  }
}

</mosaic_0001>

<bundles_post_ra>
// kernel: tpu_custom_call.1
= control target key start
LH: loop header
LB: loop body
LE: loop exit
PB: predicated region body
PF: predicated region fallthrough
CT: control target
= control target key end

     0   :  { %s702_s0 = inlined_call_operand.vmem [shape: f32[8,32], index: 0, kind: input, shape index: {}]   ;;  %s703_s1 = inlined_call_operand.vmem [shape: f32[64,32], index: 1, kind: input, shape index: {}]   ;;  %s704_s2 = inlined_call_operand.vmem [shape: f32[64,1], index: 2, kind: input, shape index: {}]   ;;  %s705_s3 = inlined_call_operand.vmem [shape: f32[32,64], index: 3, kind: input, shape index: {}]   ;;  %s706_s4 = inlined_call_operand.vmem [shape: f32[32,1], index: 4, kind: input, shape index: {}]   ;;  %s707_s5 = inlined_call_operand.vmem [shape: f32[32,1], index: 5, kind: input, shape index: {}]   ;;  %s708_s6 = inlined_call_operand.<no memory space> [shape: f32[1,1], index: 6, kind: input, shape index: {}]   ;;  %s709_s7 = inlined_call_operand.hbm [shape: f32[1,8], index: 7, kind: output, shape index: {}]  }
   0x1   :  { %v12_v0 = vstv %s708_s6 }
   0x2   :  { %13 = vst [vmem:[#allocation2] sm:$0x1] %v12_v0 }
   0x3   :  { %v29_v1 = vld [vmem:[%s702_s0] sm:$0xff]  ;;  %vm86_vm0 = vcmask 261120   ;;  %v31_v3 = vld [vmem:[%s703_s1 + $0x8] sm:$0xff]  ;;  %v540_v4 = vmov 0   ;;  %v32_v5 = vld [vmem:[%s703_s1 + $0x10] sm:$0xff] }
   0x4   :  { %v30_v2 = vld [vmem:[%s703_s1] sm:$0xff]  ;;  %460 = vmatprep.subr.msk.mxu0 %vm86_vm0, %v29_v1  ;;  %514 = vset.pattern.permute.xlu0 %v540_v4  ;;  %v40_v7 = vld [vmem:[%s704_s2 + $0x10] sm:$0xff]  ;;  %v39_v8 = vld [vmem:[%s704_s2 + $0x8] sm:$0xff] }
   0x5   :  { %462 = vmatprep.mubr.msk.f32.mxu0 %vm86_vm0, %v30_v2  ;;  %461 = vmatpush3.xpose.msk.msra.mxu0 %vm86_vm0, %v29_v1  ;;  %v38_v6 = vld [vmem:[%s704_s2] sm:$0xff]  ;;  %v41_v9 = vld [vmem:[%s704_s2 + $0x18] sm:$0xff] }
   0x6   :  { %515 = vset.pattern.permute.xlu1 %v540_v4  ;;  %48 = vperm.xlu0 %514, %v38_v6   ;;  %v33_v10 = vld [vmem:[%s703_s1 + $0x18] sm:$0xff]  ;;  %v34_v11 = vld [vmem:[%s703_s1 + $0x20] sm:$0xff] }
   0x7   :  { %58 = vperm.xlu1 %515, %v40_v7  }
   0x8   :  { %463 = vmatmul.mubr.msk.f32.vlgmr.msra.gmra.mrb[0].mxu0 %vm86_vm0, %v31_v3 }
   0x9   :  { %465 = vmatprep.mubr.msk.f32.mxu0 %vm86_vm0, %v32_v5 }
   0xa   :  { %53 = vperm.xlu0 %514, %v39_v8  }
   0xb   :  { %63 = vperm.xlu1 %515, %v41_v9  }
   0xc   :  { %14 = vsyncpa [#allocation4], 0  ;;  %466 = vmatmul.mubr.msk.f32.gmra.mrb[2].mxu0 %vm86_vm0, %v33_v10  ;;  %v42_v12 = vld [vmem:[%s704_s2 + $0x20] sm:$0xff]  ;;  %v43_v13 = vld [vmem:[%s704_s2 + $0x28] sm:$0xff]  ;;  %vm255_vm1 = vcmask 523264   ;;  %vm385_vm2 = vcmask 64512  }
   0xd   :  { %468 = vmatprep.mubr.msk.f32.mxu0 %vm86_vm0, %v34_v11  ;;  %v35_v14 = vld [vmem:[%s703_s1 + $0x28] sm:$0xff]  ;;  %v36_v15 = vld [vmem:[%s703_s1 + $0x30] sm:$0xff]  ;;  %v45_v17 = vld [vmem:[%s704_s2 + $0x38] sm:$0xff]  ;;  %vm410_vm3 = vcmask 57344  }
   0xe   :  { %68 = vperm.xlu0 %514, %v42_v12   ;;  %v44_v16 = vld [vmem:[%s704_s2 + $0x30] sm:$0xff]  ;;  %v37_v18 = vld [vmem:[%s703_s1 + $0x38] sm:$0xff]  ;;  %v231_v19 = vld [vmem:[%s706_s4] sm:$0xff] }
   0xf   :  { %73 = vperm.xlu1 %515, %v43_v13   ;;  %v232_v20 = vld [vmem:[%s706_s4 + $0x8] sm:$0xff]  ;;  %v233_v21 = vld [vmem:[%s706_s4 + $0x10] sm:$0xff]  ;;  %v234_v22 = vld [vmem:[%s706_s4 + $0x18] sm:$0xff] }
  0x10   :  { %469 = vmatmul.mubr.msk.f32.gmra.mrb[4].mxu0 %vm86_vm0, %v35_v14  ;;  %v357_v23 = vld [vmem:[%s707_s5] sm:$0xff]  ;;  %v358_v24 = vld [vmem:[%s707_s5 + $0x8] sm:$0xff]  ;;  %v359_v25 = vld [vmem:[%s707_s5 + $0x10] sm:$0xff] }
  0x11   :  { %471 = vmatprep.mubr.msk.f32.mxu0 %vm86_vm0, %v36_v15  ;;  %v360_v26 = vld [vmem:[%s707_s5 + $0x18] sm:$0xff]  ;;  %v399_v27 = vld [vmem:[#allocation2] sm:$0x1]  ;;  %v228_v1 = vld [vmem:[%s705_s3 + $0x8] sm:$0xff] }
  0x12   :  { %78 = vperm.xlu0 %514, %v44_v16   ;;  %v227_v28 = vld [vmem:[%s705_s3] sm:$0xff]  ;;  %v229_v2 = vld [vmem:[%s705_s3 + $0x10] sm:$0xff]  ;;  %v230_v3 = vld [vmem:[%s705_s3 + $0x18] sm:$0xff]  ;;  %s541_s3 = smov [#allocation3]  }
  0x13   :  { %83 = vperm.xlu1 %515, %v45_v17   ;;  %490 = vmatprep.mubr.msk.f32.mxu1 %vm255_vm1, %v227_v28  ;;  %s418_s30 = sshll.u32 %s541_s3, 4  ;;  %s419_s30 = int_to_ptr.vmem [resolvable:$true] %s418_s30 }
  0x14   :  { %472 = vmatmul.mubr.msk.f32.gmra.mrb[6].mxu0 %vm86_vm0, %v37_v18  ;;  %s516_s8 = scalar_lea.vmem %s419_s30, 16  ;;  %s520_s6 = scalar_lea.vmem %s419_s30, 32 }
  0x15   :  { %p517_p0 = scmp.ne.s32.totalorder %s419_s30, %s516_s8  ;;  %p521_p1 = scmp.lt.s32.totalorder %s419_s30, %s419_s30 }
  0x16   :  { %237 = vperm.xlu0 %514, %v231_v19   ;;  %p522_p2 = scmp.lt.s32.totalorder %s520_s6, %s516_s8 }
  0x17   :  { %242 = vperm.xlu1 %515, %v232_v20  }
  0x18   :  { %p523_p3 = por %p522_p2, %p521_p1 }
  0x1a   :  { %247 = vperm.xlu0 %514, %v233_v21   ;;  %p524_p4 = pnand %p523_p3, %p517_p0 }
  0x1b   :  { %252 = vperm.xlu1 %515, %v234_v22  }
  0x1e   :  { %363 = vperm.xlu0 %514, %v357_v23  }
  0x1f   :  { %368 = vperm.xlu1 %515, %v358_v24  }
  0x22   :  { %373 = vperm.xlu0 %514, %v359_v25  }
  0x23   :  { %378 = vperm.xlu1 %515, %v360_v26  }
  0x26   :  { %402 = vperm.xlu0 %514, %v399_v27  }
  0x85   :  { %v49_v29 = vpop.permute.xlu0 %48 }
  0x86   :  { %v59_v30 = vpop.permute.xlu1 %58 }
  0x89   :  { %v54_v31 = vpop.permute.xlu0 %53 }
  0x8a   :  { %v64_v32 = vpop.permute.xlu1 %63 }
  0x8d   :  { %v69_v45 = vpop.permute.xlu0 %68 }
  0x8e   :  { %v74_v42 = vpop.permute.xlu1 %73 }
  0x91   :  { %v79_v57 = vpop.permute.xlu0 %78 }
  0x92   :  { %v84_v54 = vpop.permute.xlu1 %83 }
  0x95   :  { %v238_v4 = vpop.permute.xlu0 %237 }
  0x96   :  { %v243_v5 = vpop.permute.xlu1 %242 }
  0x99   :  { %v248_v6 = vpop.permute.xlu0 %247 }
  0x9a   :  { %v253_v7 = vpop.permute.xlu1 %252 }
  0x9d   :  { %v364_v12 = vpop.permute.xlu0 %363 }
  0x9e   :  { %v369_v13 = vpop.permute.xlu1 %368 }
  0xa1   :  { %v374_v26 = vpop.permute.xlu0 %373 }
  0xa2   :  { %v379_v27 = vpop.permute.xlu1 %378 }
  0xdb   :  { %v464_v33 = vpop.f32.mrb[0].mxu0 }
  0xdc   :  { %v186_v34 = vadd.f32 %v464_v33, %v54_v31  ;;  %v180_v35 = vpop.f32.mrb[1].mxu0 }
  0xdd   :  { %v181_v36 = vadd.f32 %v180_v35, %v49_v29 }
  0xde   :  { %v220_v37 = vmax.f32 %v186_v34, 0.0  ;;  %v405_v34 = vlaneseq }
  0xdf   :  { %v219_v38 = vmax.f32 %v181_v36, 0.0  ;;  %v467_v39 = vpop.f32.mrb[2].mxu0 }
  0xe0   :  { %v196_v40 = vadd.f32 %v467_v39, %v64_v32  ;;  %v190_v41 = vpop.f32.mrb[3].mxu0 }
  0xe1   :  { %v191_v43 = vadd.f32 %v190_v41, %v59_v30  ;;  %v496_v44 = vpack.c.bf16 %v220_v37, %v219_v38  ;;  %v406_v37 = vshrl.u32 %v405_v34, 7 }
  0xe2   :  { %v222_v46 = vmax.f32 %v196_v40, 0.0 }
  0xe3   :  { %v221_v47 = vmax.f32 %v191_v43, 0.0  ;;  %v470_v48 = vpop.f32.mrb[4].mxu0  ;;  %497 = vmatprep.subr.bf16.mxu1 %v496_v44  ;;  %v407_v40 = vsub.s32 0, %v406_v37 }
  0xe4   :  { %v206_v49 = vadd.f32 %v470_v48, %v74_v42  ;;  %v200_v50 = vpop.f32.mrb[5].mxu0  ;;  %499 = vmatpush3.bf16.msra.mxu1 %v496_v44  ;;  %v403_v42 = vpop.permute.xlu0 %402 }
  0xe5   :  { %v500_v51 = vpack.c.bf16 %v222_v46, %v221_v47  ;;  %v201_v52 = vadd.f32 %v200_v50, %v69_v45  ;;  %v408_v44 = vrot.slane %v403_v42, %v407_v40 }
  0xe6   :  { %v224_v53 = vmax.f32 %v206_v49, 0.0 }
  0xe7   :  { %v223_v55 = vmax.f32 %v201_v52, 0.0  ;;  %v473_v56 = vpop.f32.mrb[6].mxu0  ;;  %501 = vmatprep.subr.bf16.mxu1 %v500_v51 }
  0xe8   :  { %v216_v58 = vadd.f32 %v473_v56, %v84_v54  ;;  %v210_v59 = vpop.f32.mrb[7].mxu0  ;;  %503 = vmatpush3.bf16.msra.mxu1 %v500_v51 }
  0xe9   :  { %v504_v60 = vpack.c.bf16 %v224_v53, %v223_v55  ;;  %v211_v61 = vadd.f32 %v210_v59, %v79_v57 }
  0xea   :  { %v226_v62 = vmax.f32 %v216_v58, 0.0 }
  0xeb   :  { %v225_v63 = vmax.f32 %v211_v61, 0.0  ;;  %505 = vmatprep.subr.bf16.mxu1 %v504_v60 }
  0xec   :  { %507 = vmatpush3.bf16.msra.mxu1 %v504_v60 }
  0xed   :  { %v508_v0 = vpack.c.bf16 %v226_v62, %v225_v63 }
  0xef   :  { %509 = vmatprep.subr.bf16.mxu1 %v508_v0 }
  0xf0   :  { %511 = vmatpush3.bf16.msra.mxu1 %v508_v0 }
  0xf3   :  { %491 = vmatmul.mubr.msk.f32.vlgmr.msra.gmra.mrb[0].mxu1 %vm255_vm1, %v228_v1 }
  0xf4   :  { %493 = vmatprep.mubr.msk.f32.mxu1 %vm255_vm1, %v229_v2 }
  0xf7   :  { %494 = vmatmul.mubr.msk.f32.gmra.mrb[2].mxu1 %vm255_vm1, %v230_v3 }
 0x1c6   :  { %v492_v8 = vpop.f32.mrb[0].mxu1 }
 0x1c7   :  { %v340_v9 = vadd.f32 %v492_v8, %v243_v5  ;;  %v334_v10 = vpop.f32.mrb[1].mxu1 }
 0x1c8   :  { %v335_v11 = vadd.f32 %v334_v10, %v238_v4 }
 0x1c9   :  { %v354_v14 = vmax.f32 %v340_v9, 0.0 }
 0x1ca   :  { %v353_v15 = vmax.f32 %v335_v11, 0.0  ;;  %v495_v16 = vpop.f32.mrb[2].mxu1 }
 0x1cb   :  { %v382_v17 = vmul.f32 %v369_v13, %v354_v14  ;;  %v350_v18 = vadd.f32 %v495_v16, %v253_v7  ;;  %v344_v19 = vpop.f32.mrb[3].mxu1 }
 0x1cc   :  { %v381_v20 = vmul.f32 %v364_v12, %v353_v15  ;;  %v345_v21 = vadd.f32 %v344_v19, %v248_v6 }
 0x1cd   :  { %v387_v22 = vsel %vm385_vm2, %v382_v17, 0.0  ;;  %v356_v23 = vmax.f32 %v350_v18, 0.0 }
 0x1ce   :  { %v386_v24 = vsel %vm385_vm2, %v381_v20, 0.0  ;;  %v355_v25 = vmax.f32 %v345_v21, 0.0 }
 0x1cf   :  { %v388_v28 = vadd.f32 %v387_v22, %v386_v24  ;;  %v384_v29 = vmul.f32 %v379_v27, %v356_v23 }
 0x1d0   :  { %v383_v30 = vmul.f32 %v374_v26, %v355_v25 }
 0x1d1   :  { %v391_v33 = vsel %vm385_vm2, %v384_v29, 0.0 }
 0x1d2   :  { %v389_v31 = vsel %vm385_vm2, %v383_v30, 0.0 }
 0x1d3   :  { %v390_v32 = vadd.f32 %v389_v31, %v388_v28 }
 0x1d5   :  { %v392_v35 = vadd.f32 %v391_v33, %v390_v32 }
 0x1d7   :  { %v393_v36 = vrot.slane %v392_v35, 4 }
 0x1d9   :  { %v394_v38 = vadd.f32 %v393_v36, %v392_v35 }
 0x1db   :  { %v395_v39 = vrot.slane %v394_v38, 2 }
 0x1dd   :  { %v396_v41 = vadd.f32 %v395_v39, %v394_v38 }
 0x1df   :  { %v397_v43 = vrot.slane %v396_v41, 1 }
 0x1e1   :  { %v398_v45 = vadd.f32 %v397_v43, %v396_v41 }
 0x1e3   :  { %v409_v46 = vadd.f32 %v408_v44, %v398_v45 }
 0x1e5   :  { %411 = vst.msk [vmem:[#allocation3] sm:$0x1] %vm410_vm3, %v409_v46 }
 0x1e6   :  { %527 = shalt.err (!%p524_p4)
}
 0x1e7   :  { %s528_s10 = scalar_lea.hbm %s709_s7, 16 }
 0x1e8   :  { %p529_p5 = scmp.ne.s32.totalorder %s709_s7, %s528_s10  ;;  %p532_p6 = scmp.lt.u32.totalorder %s528_s10, %s709_s7 }
 0x1ea   :  { %p534_p7 = pnand %p532_p6, %p529_p5 }
 0x1ec   :  { %537 = shalt.err (!%p534_p7)
}
 0x1ed   :  { %421 = dma.vmem_to_hbm [thread:$0]  %s419_s30, 16, %s709_s7, [#allocation4]  }
 0x1ee   :  { %538 = dma.done.wait [#allocation4], 16  }
 0x1ef   :  { %539 = vsyncadd [#allocation4], 4294967280 }
 0x1f0   :  { %425 = vsyncpa [#allocation4], 1 }

</bundles_post_ra>
